<compile_context>
chip_gen: v7x
topology: tpu7x:2x2x1
jax: 0.10.0
libtpu: 0.0.40
codegen_flags: <defaults>
</compile_context>

<pallas_src>
import functools

import numpy as np
import jax
import jax.numpy as jnp
from jax.experimental import pallas as pl
from jax.experimental.pallas import tpu as pltpu


# ----------------------- bilinear interpolation matrices (host-side, precomputed) ----

def _bilinear_matrix_np(in_size: int, out_size: int, scale: float) -> np.ndarray:
    """Separable bilinear interp matrix, PyTorch nn.Upsample(align_corners=False)."""
    dst = np.arange(out_size, dtype=np.float64)
    src = (dst + 0.5) / float(scale) - 0.5
    src = np.clip(src, 0.0, in_size - 1)
    lo = np.floor(src).astype(np.int64)
    hi = np.minimum(lo + 1, in_size - 1)
    w_hi = (src - lo).astype(np.float32)
    w_lo = (1.0 - w_hi).astype(np.float32)
    m = np.zeros((out_size, in_size), np.float32)
    m[np.arange(out_size), lo] += w_lo
    m[np.arange(out_size), hi] += w_hi
    return m


def make_upsample_matrix(hin: int, win: int, scale: float) -> jnp.ndarray:
    """U^T of shape (Hin*Win, Hout*Wout): y_flat @ U^T == separable bilinear upsample."""
    hout, wout = int(hin * scale), int(win * scale)
    wh = _bilinear_matrix_np(hin, hout, scale)   # (Hout, Hin)
    ww = _bilinear_matrix_np(win, wout, scale)   # (Wout, Win)
    u_t = np.einsum("oh,pw->hwop", wh, ww).reshape(hin * win, hout * wout)
    return jnp.asarray(u_t)


# ------------------------------- Pallas kernels --------------------------------

def _pool_conv_relu_kernel(xp_ref, wt_ref, b_ref, o_ref):
    # xp: (4, Cin, M)  four 2x2-pool taps; channels on sublanes, spatial (M) on lanes.
    # wt: (Cout, Cin)  b: (Cout, 1)  o: (Cout, M)   -> lane-dense output.
    pooled = (xp_ref[0] + xp_ref[1] + xp_ref[2] + xp_ref[3]) * 0.25          # (Cin, M)  VPU
    acc = jnp.dot(wt_ref[...], pooled, preferred_element_type=jnp.float32)   # (Cout, M) MXU
    o_ref[...] = jnp.maximum(acc + b_ref[...], 0.0)


def pool2_conv1x1_relu(x_nchw, wt, b, *, tm_max=512):
    """Fused 2x2 avg-pool + 1x1 conv + ReLU.  x: (N, Cin, H, W) -> (N, Cout, H//2, W//2)."""
    n, cin, h, w = x_nchw.shape
    ho, wo = h // 2, w // 2
    m = ho * wo
    cout = wt.shape[0]

    # Arrange the four pool taps on a leading axis; spatial stays flattened on lanes.
    xp = (x_nchw.reshape(n, cin, ho, 2, wo, 2)
                .transpose(0, 3, 5, 1, 2, 4)
                .reshape(n, 4, cin, m))

    # Tile the spatial axis so large inputs pipeline instead of blowing VMEM.
    tm = m if m <= tm_max else tm_max
    assert m % tm == 0, "spatial tile must divide M"
    grid = (n, m // tm)

    out = pl.pallas_call(
        _pool_conv_relu_kernel,
        out_shape=jax.ShapeDtypeStruct((n, cout, m), jnp.float32),
        grid=grid,
        in_specs=[
            pl.BlockSpec((None, 4, cin, tm), lambda i, j: (i, 0, 0, j)),
            pl.BlockSpec((cout, cin), lambda i, j: (0, 0)),
            pl.BlockSpec((cout, 1), lambda i, j: (0, 0)),
        ],
        out_specs=pl.BlockSpec((None, cout, tm), lambda i, j: (i, 0, j)),
        compiler_params=pltpu.CompilerParams(
            dimension_semantics=("parallel", "parallel")),
    )(xp, wt, b.reshape(cout, 1))
    return out.reshape(n, cout, ho, wo)


def _make_upsample_concat_kernel(c_sizes):
    """Kernel that upsamples each feature (one matmul each) and writes it directly
    into its channel slice of the concatenated output block."""
    offsets, off = [], 0
    for c in c_sizes:
        offsets.append(off)
        off += c

    def kernel(*refs):
        o_ref = refs[-1]                                   # (C_total, Hout*Wout)
        for i, (c, start) in enumerate(zip(c_sizes, offsets)):
            y_ref = refs[2 * i]                            # (C_i, Hin_i*Win_i)
            u_ref = refs[2 * i + 1]                        # (Hin_i*Win_i, Hout*Wout)
            o_ref[start:start + c, :] = jnp.dot(
                y_ref[...], u_ref[...], preferred_element_type=jnp.float32)

    return kernel


def upsample_concat(features, up_mats, out_hw):
    """Bilinear-upsample every feature to out_hw and concat on channels, in ONE kernel."""
    n = features[0].shape[0]
    hout, wout = out_hw
    hw = hout * wout
    c_sizes = tuple(int(f.shape[1]) for f in features)
    c_total = sum(c_sizes)

    inputs, in_specs = [], []
    for f, u in zip(features, up_mats):
        _, ci, hi, wi = f.shape
        si = hi * wi
        assert u.shape == (si, hw)
        inputs.append(f.reshape(n, ci, si))                # free reshape (NCHW flatten)
        in_specs.append(pl.BlockSpec((None, ci, si), lambda i: (i, 0, 0)))
        inputs.append(u)
        in_specs.append(pl.BlockSpec((si, hw), lambda i: (0, 0)))

    out = pl.pallas_call(
        _make_upsample_concat_kernel(c_sizes),
        out_shape=jax.ShapeDtypeStruct((n, c_total, hw), jnp.float32),
        grid=(n,),
        in_specs=in_specs,
        out_specs=pl.BlockSpec((None, c_total, hw), lambda i: (i, 0, 0)),
        compiler_params=pltpu.CompilerParams(dimension_semantics=("parallel",)),
    )(*inputs)
    return out.reshape(n, c_total, hout, wout)


# ------------------------- synthetic backbone + wrapper -------------------------

def backbone_wrapper_forward(x, params, up_mats, scale_factors):
    # Synthetic backbone: two stages of fused (2x2 avg-pool -> 1x1 conv -> ReLU).
    f0 = pool2_conv1x1_relu(x, params["w0"].T, params["b0"])    # (N, 8, H/2, W/2)
    f1 = pool2_conv1x1_relu(f0, params["w1"].T, params["b1"])   # (N, 16, H/4, W/4)
    y = [f0, f1]

    # BackboneWrapper: bilinear upsample each feature + channel concat, fused.
    hin0, win0 = y[0].shape[2], y[0].shape[3]
    out_hw = (int(hin0 * scale_factors[0]), int(win0 * scale_factors[0]))
    concat_y = upsample_concat(y, up_mats, out_hw)
    return concat_y, y


# ----------------------------------- main ---------------------------------------

if __name__ == "__main__":
    key = jax.random.PRNGKey(0)
    kx, k0, k1, kb0, kb1 = jax.random.split(key, 5)

    N, C, H, W = 2, 4, 16, 16
    x = jax.random.normal(kx, (N, C, H, W), dtype=jnp.float32)

    params = {
        "w0": 0.1 * jax.random.normal(k0, (C, 8), dtype=jnp.float32),
        "b0": 0.1 * jax.random.normal(kb0, (8,), dtype=jnp.float32),
        "w1": 0.1 * jax.random.normal(k1, (8, 16), dtype=jnp.float32),
        "b1": 0.1 * jax.random.normal(kb1, (16,), dtype=jnp.float32),
    }
    scale_factors = (2, 4)

    # Precompute the bilinear (kron) matrices once, outside the forward.
    feat_hw = [(H // 2, W // 2), (H // 4, W // 4)]
    up_mats = tuple(make_upsample_matrix(h_, w_, s)
                    for (h_, w_), s in zip(feat_hw, scale_factors))

    fwd = jax.jit(backbone_wrapper_forward, static_argnums=3)
    concat_y, y = fwd(x, params, up_mats, scale_factors)
    concat_y = jax.block_until_ready(concat_y)
    y = [jax.block_until_ready(t) for t in y]

    # Shape checks: features at H/2 and H/4, both upsampled back to (H, W), concat on C.
    assert y[0].shape == (N, 8, H // 2, W // 2)
    assert y[1].shape == (N, 16, H // 4, W // 4)
    assert concat_y.shape == (N, 8 + 16, H, W)

    # Numerical check of the fused pool+conv+relu stages against pure JAX.
    def ref_stage(t, w, b):
        n_, c_, h_, w_ = t.shape
        p = t.reshape(n_, c_, h_ // 2, 2, w_ // 2, 2).mean(axis=(3, 5))
        return jax.nn.relu(jnp.einsum("nchw,ck->nkhw", p, w) + b[None, :, None, None])

    ref_f0 = ref_stage(x, params["w0"], params["b0"])
    ref_f1 = ref_stage(ref_f0, params["w1"], params["b1"])
    assert jnp.allclose(y[0], ref_f0, atol=1e-5, rtol=1e-5)
    assert jnp.allclose(y[1], ref_f1, atol=1e-5, rtol=1e-5)

    # Numerical check of the fused upsample+concat against a separable bilinear reference.
    def ref_up(t, s):
        _, _, h_, w_ = t.shape
        wh = jnp.asarray(_bilinear_matrix_np(h_, int(h_ * s), s))
        ww = jnp.asarray(_bilinear_matrix_np(w_, int(w_ * s), s))
        return jnp.einsum("oh,nchw,pw->ncop", wh, t, ww)

    ref_concat = jnp.concatenate(
        [ref_up(ref_f0, scale_factors[0]), ref_up(ref_f1, scale_factors[1])], axis=1)
    assert jnp.allclose(concat_y, ref_concat, atol=1e-5, rtol=1e-5)

    print("KERNEL_OK")
</pallas_src>

<mosaic_0001>
module attributes {stable_mosaic.version = 11 : i64} {
  func.func @_pool_conv_relu_kernel(%arg0: i32, %arg1: i32, %arg2: memref<1x4x4x64xf32, #tpu.memory_space<vmem>>, %arg3: memref<8x4xf32, #tpu.memory_space<vmem>>, %arg4: memref<8x1xf32, #tpu.memory_space<vmem>>, %arg5: memref<1x8x64xf32, #tpu.memory_space<vmem>>) attributes {dimension_semantics = [#tpu.dimension_semantics<parallel>, #tpu.dimension_semantics<parallel>], iteration_bounds = array<i64: 2, 1>, scalar_prefetch = 0 : i64, scratch_operands = 0 : i64, tpu.core_type = #tpu.core_type<tc>, window_params = [{transform_indices = @transform_0, window_bounds = array<i64: 1, 4, 4, 64>}, {pipeline_mode = #tpu.pipeline_mode<synchronous>, transform_indices = @transform_1, window_bounds = array<i64: 8, 4>}, {pipeline_mode = #tpu.pipeline_mode<synchronous>, transform_indices = @transform_2, window_bounds = array<i64: 8, 1>}, {transform_indices = @transform_3, window_bounds = array<i64: 1, 8, 64>}]} {
    %c0 = arith.constant 0 : index
    %c0_0 = arith.constant 0 : index
    %c0_1 = arith.constant 0 : index
    %c0_2 = arith.constant 0 : index
    %0 = vector.load %arg2[%c0, %c0_0, %c0_1, %c0_2] : memref<1x4x4x64xf32, #tpu.memory_space<vmem>>, vector<1x1x4x64xf32>
    %1 = vector.shape_cast %0 : vector<1x1x4x64xf32> to vector<4x64xf32>
    %c0_3 = arith.constant 0 : index
    %c1 = arith.constant 1 : index
    %c0_4 = arith.constant 0 : index
    %c0_5 = arith.constant 0 : index
    %2 = vector.load %arg2[%c0_3, %c1, %c0_4, %c0_5] : memref<1x4x4x64xf32, #tpu.memory_space<vmem>>, vector<1x1x4x64xf32>
    %3 = vector.shape_cast %2 : vector<1x1x4x64xf32> to vector<4x64xf32>
    %4 = arith.addf %1, %3 : vector<4x64xf32>
    %c0_6 = arith.constant 0 : index
    %c2 = arith.constant 2 : index
    %c0_7 = arith.constant 0 : index
    %c0_8 = arith.constant 0 : index
    %5 = vector.load %arg2[%c0_6, %c2, %c0_7, %c0_8] : memref<1x4x4x64xf32, #tpu.memory_space<vmem>>, vector<1x1x4x64xf32>
    %6 = vector.shape_cast %5 : vector<1x1x4x64xf32> to vector<4x64xf32>
    %7 = arith.addf %4, %6 : vector<4x64xf32>
    %c0_9 = arith.constant 0 : index
    %c3 = arith.constant 3 : index
    %c0_10 = arith.constant 0 : index
    %c0_11 = arith.constant 0 : index
    %8 = vector.load %arg2[%c0_9, %c3, %c0_10, %c0_11] : memref<1x4x4x64xf32, #tpu.memory_space<vmem>>, vector<1x1x4x64xf32>
    %9 = vector.shape_cast %8 : vector<1x1x4x64xf32> to vector<4x64xf32>
    %10 = arith.addf %7, %9 : vector<4x64xf32>
    %cst = arith.constant 2.500000e-01 : f32
    %11 = vector.broadcast %cst : f32 to vector<4x64xf32>
    %12 = arith.mulf %10, %11 : vector<4x64xf32>
    %c0_12 = arith.constant 0 : index
    %c0_13 = arith.constant 0 : index
    %13 = vector.load %arg3[%c0_12, %c0_13] : memref<8x4xf32, #tpu.memory_space<vmem>>, vector<8x4xf32>
    %cst_14 = arith.constant dense<0.000000e+00> : vector<8x64xf32>
    %14 = tpu.matmul %13, %12, %cst_14 {dimension_numbers = #tpu.dot_dimension_numbers<[1], [0], [0], [1], [0, 0, 1, 1], [], []>} : vector<8x4xf32>, vector<4x64xf32>, vector<8x64xf32> -> vector<8x64xf32>
    %c0_15 = arith.constant 0 : index
    %c0_16 = arith.constant 0 : index
    %15 = vector.load %arg4[%c0_15, %c0_16] : memref<8x1xf32, #tpu.memory_space<vmem>>, vector<8x1xf32>
    %16 = vector.broadcast %15 : vector<8x1xf32> to vector<8x64xf32>
    %17 = arith.addf %14, %16 : vector<8x64xf32>
    %cst_17 = arith.constant 0.000000e+00 : f32
    %18 = vector.broadcast %cst_17 : f32 to vector<8x64xf32>
    %19 = arith.maximumf %17, %18 : vector<8x64xf32>
    %c0_18 = arith.constant 0 : index
    %c0_19 = arith.constant 0 : index
    %c0_20 = arith.constant 0 : index
    %20 = vector.load %arg5[%c0_18, %c0_19, %c0_20] : memref<1x8x64xf32, #tpu.memory_space<vmem>>, vector<1x8x64xf32>
    %21 = vector.shape_cast %20 : vector<1x8x64xf32> to vector<8x64xf32>
    %22 = vector.shape_cast %19 : vector<8x64xf32> to vector<1x8x64xf32>
    tpu.vector_store %arg5[%c0_18, %c0_19, %c0_20], %22 {strides = array<i32>} : memref<1x8x64xf32, #tpu.memory_space<vmem>>, vector<1x8x64xf32>,
    return
  }
  func.func @transform_0(%arg0: i32, %arg1: i32) -> (i32, i32, i32, i32) {
    %c0_i32 = arith.constant 0 : i32
    %c0_i32_0 = arith.constant 0 : i32
    %c0_i32_1 = arith.constant 0 : i32
    return %arg0, %c0_i32, %c0_i32_0, %arg1 : i32, i32, i32, i32
  }
  func.func @transform_1(%arg0: i32, %arg1: i32) -> (i32, i32) {
    %c0_i32 = arith.constant 0 : i32
    %c0_i32_0 = arith.constant 0 : i32
    %c0_i32_1 = arith.constant 0 : i32
    return %c0_i32, %c0_i32_0 : i32, i32
  }
  func.func @transform_2(%arg0: i32, %arg1: i32) -> (i32, i32) {
    %c0_i32 = arith.constant 0 : i32
    %c0_i32_0 = arith.constant 0 : i32
    %c0_i32_1 = arith.constant 0 : i32
    return %c0_i32, %c0_i32_0 : i32, i32
  }
  func.func @transform_3(%arg0: i32, %arg1: i32) -> (i32, i32, i32) {
    %c0_i32 = arith.constant 0 : i32
    %c0_i32_0 = arith.constant 0 : i32
    return %arg0, %c0_i32, %arg1 : i32, i32, i32
  }
}

module attributes {stable_mosaic.version = 11 : i64} {
  func.func @_pool_conv_relu_kernel(%arg0: i32, %arg1: i32, %arg2: memref<1x4x8x16xf32, #tpu.memory_space<vmem>>, %arg3: memref<16x8xf32, #tpu.memory_space<vmem>>, %arg4: memref<16x1xf32, #tpu.memory_space<vmem>>, %arg5: memref<1x16x16xf32, #tpu.memory_space<vmem>>) attributes {dimension_semantics = [#tpu.dimension_semantics<parallel>, #tpu.dimension_semantics<parallel>], iteration_bounds = array<i64: 2, 1>, scalar_prefetch = 0 : i64, scratch_operands = 0 : i64, tpu.core_type = #tpu.core_type<tc>, window_params = [{transform_indices = @transform_0, window_bounds = array<i64: 1, 4, 8, 16>}, {pipeline_mode = #tpu.pipeline_mode<synchronous>, transform_indices = @transform_1, window_bounds = array<i64: 16, 8>}, {pipeline_mode = #tpu.pipeline_mode<synchronous>, transform_indices = @transform_2, window_bounds = array<i64: 16, 1>}, {transform_indices = @transform_3, window_bounds = array<i64: 1, 16, 16>}]} {
    %c0 = arith.constant 0 : index
    %c0_0 = arith.constant 0 : index
    %c0_1 = arith.constant 0 : index
    %c0_2 = arith.constant 0 : index
    %0 = vector.load %arg2[%c0, %c0_0, %c0_1, %c0_2] : memref<1x4x8x16xf32, #tpu.memory_space<vmem>>, vector<1x1x8x16xf32>
    %1 = vector.shape_cast %0 : vector<1x1x8x16xf32> to vector<8x16xf32>
    %c0_3 = arith.constant 0 : index
    %c1 = arith.constant 1 : index
    %c0_4 = arith.constant 0 : index
    %c0_5 = arith.constant 0 : index
    %2 = vector.load %arg2[%c0_3, %c1, %c0_4, %c0_5] : memref<1x4x8x16xf32, #tpu.memory_space<vmem>>, vector<1x1x8x16xf32>
    %3 = vector.shape_cast %2 : vector<1x1x8x16xf32> to vector<8x16xf32>
    %4 = arith.addf %1, %3 : vector<8x16xf32>
    %c0_6 = arith.constant 0 : index
    %c2 = arith.constant 2 : index
    %c0_7 = arith.constant 0 : index
    %c0_8 = arith.constant 0 : index
    %5 = vector.load %arg2[%c0_6, %c2, %c0_7, %c0_8] : memref<1x4x8x16xf32, #tpu.memory_space<vmem>>, vector<1x1x8x16xf32>
    %6 = vector.shape_cast %5 : vector<1x1x8x16xf32> to vector<8x16xf32>
    %7 = arith.addf %4, %6 : vector<8x16xf32>
    %c0_9 = arith.constant 0 : index
    %c3 = arith.constant 3 : index
    %c0_10 = arith.constant 0 : index
    %c0_11 = arith.constant 0 : index
    %8 = vector.load %arg2[%c0_9, %c3, %c0_10, %c0_11] : memref<1x4x8x16xf32, #tpu.memory_space<vmem>>, vector<1x1x8x16xf32>
    %9 = vector.shape_cast %8 : vector<1x1x8x16xf32> to vector<8x16xf32>
    %10 = arith.addf %7, %9 : vector<8x16xf32>
    %cst = arith.constant 2.500000e-01 : f32
    %11 = vector.broadcast %cst : f32 to vector<8x16xf32>
    %12 = arith.mulf %10, %11 : vector<8x16xf32>
    %c0_12 = arith.constant 0 : index
    %c0_13 = arith.constant 0 : index
    %13 = vector.load %arg3[%c0_12, %c0_13] : memref<16x8xf32, #tpu.memory_space<vmem>>, vector<16x8xf32>
    %cst_14 = arith.constant dense<0.000000e+00> : vector<16x16xf32>
    %14 = tpu.matmul %13, %12, %cst_14 {dimension_numbers = #tpu.dot_dimension_numbers<[1], [0], [0], [1], [0, 0, 1, 1], [], []>} : vector<16x8xf32>, vector<8x16xf32>, vector<16x16xf32> -> vector<16x16xf32>
    %c0_15 = arith.constant 0 : index
    %c0_16 = arith.constant 0 : index
    %15 = vector.load %arg4[%c0_15, %c0_16] : memref<16x1xf32, #tpu.memory_space<vmem>>, vector<16x1xf32>
    %16 = vector.broadcast %15 : vector<16x1xf32> to vector<16x16xf32>
    %17 = arith.addf %14, %16 : vector<16x16xf32>
    %cst_17 = arith.constant 0.000000e+00 : f32
    %18 = vector.broadcast %cst_17 : f32 to vector<16x16xf32>
    %19 = arith.maximumf %17, %18 : vector<16x16xf32>
    %c0_18 = arith.constant 0 : index
    %c0_19 = arith.constant 0 : index
    %c0_20 = arith.constant 0 : index
    %20 = vector.load %arg5[%c0_18, %c0_19, %c0_20] : memref<1x16x16xf32, #tpu.memory_space<vmem>>, vector<1x16x16xf32>
    %21 = vector.shape_cast %20 : vector<1x16x16xf32> to vector<16x16xf32>
    %22 = vector.shape_cast %19 : vector<16x16xf32> to vector<1x16x16xf32>
    tpu.vector_store %arg5[%c0_18, %c0_19, %c0_20], %22 {strides = array<i32>} : memref<1x16x16xf32, #tpu.memory_space<vmem>>, vector<1x16x16xf32>,
    return
  }
  func.func @transform_0(%arg0: i32, %arg1: i32) -> (i32, i32, i32, i32) {
    %c0_i32 = arith.constant 0 : i32
    %c0_i32_0 = arith.constant 0 : i32
    %c0_i32_1 = arith.constant 0 : i32
    return %arg0, %c0_i32, %c0_i32_0, %arg1 : i32, i32, i32, i32
  }
  func.func @transform_1(%arg0: i32, %arg1: i32) -> (i32, i32) {
    %c0_i32 = arith.constant 0 : i32
    %c0_i32_0 = arith.constant 0 : i32
    %c0_i32_1 = arith.constant 0 : i32
    return %c0_i32, %c0_i32_0 : i32, i32
  }
  func.func @transform_2(%arg0: i32, %arg1: i32) -> (i32, i32) {
    %c0_i32 = arith.constant 0 : i32
    %c0_i32_0 = arith.constant 0 : i32
    %c0_i32_1 = arith.constant 0 : i32
    return %c0_i32, %c0_i32_0 : i32, i32
  }
  func.func @transform_3(%arg0: i32, %arg1: i32) -> (i32, i32, i32) {
    %c0_i32 = arith.constant 0 : i32
    %c0_i32_0 = arith.constant 0 : i32
    return %arg0, %c0_i32, %arg1 : i32, i32, i32
  }
}

module attributes {stable_mosaic.version = 11 : i64} {
  func.func @kernel(%arg0: i32, %arg1: memref<1x8x64xf32, #tpu.memory_space<vmem>>, %arg2: memref<64x256xf32, #tpu.memory_space<vmem>>, %arg3: memref<1x16x16xf32, #tpu.memory_space<vmem>>, %arg4: memref<16x256xf32, #tpu.memory_space<vmem>>, %arg5: memref<1x24x256xf32, #tpu.memory_space<vmem>>) attributes {dimension_semantics = [#tpu.dimension_semantics<parallel>], iteration_bounds = array<i64: 2>, scalar_prefetch = 0 : i64, scratch_operands = 0 : i64, tpu.core_type = #tpu.core_type<tc>, window_params = [{transform_indices = @transform_0, window_bounds = array<i64: 1, 8, 64>}, {pipeline_mode = #tpu.pipeline_mode<synchronous>, transform_indices = @transform_1, window_bounds = array<i64: 64, 256>}, {transform_indices = @transform_2, window_bounds = array<i64: 1, 16, 16>}, {pipeline_mode = #tpu.pipeline_mode<synchronous>, transform_indices = @transform_3, window_bounds = array<i64: 16, 256>}, {transform_indices = @transform_4, window_bounds = array<i64: 1, 24, 256>}]} {
    %c0 = arith.constant 0 : index
    %c0_0 = arith.constant 0 : index
    %c0_1 = arith.constant 0 : index
    %0 = vector.load %arg1[%c0, %c0_0, %c0_1] : memref<1x8x64xf32, #tpu.memory_space<vmem>>, vector<1x8x64xf32>
    %1 = vector.shape_cast %0 : vector<1x8x64xf32> to vector<8x64xf32>
    %c0_2 = arith.constant 0 : index
    %c0_3 = arith.constant 0 : index
    %2 = vector.load %arg2[%c0_2, %c0_3] : memref<64x256xf32, #tpu.memory_space<vmem>>, vector<64x256xf32>
    %cst = arith.constant dense<0.000000e+00> : vector<8x256xf32>
    %3 = tpu.matmul %1, %2, %cst {dimension_numbers = #tpu.dot_dimension_numbers<[1], [0], [0], [1], [0, 0, 1, 1], [], []>} : vector<8x64xf32>, vector<64x256xf32>, vector<8x256xf32> -> vector<8x256xf32>
    %c0_4 = arith.constant 0 : index
    %c0_5 = arith.constant 0 : index
    %c0_6 = arith.constant 0 : index
    %4 = vector.load %arg5[%c0_4, %c0_5, %c0_6] : memref<1x24x256xf32, #tpu.memory_space<vmem>>, vector<1x8x256xf32>
    %5 = vector.shape_cast %4 : vector<1x8x256xf32> to vector<8x256xf32>
    %6 = vector.shape_cast %3 : vector<8x256xf32> to vector<1x8x256xf32>
    tpu.vector_store %arg5[%c0_4, %c0_5, %c0_6], %6 {strides = array<i32>} : memref<1x24x256xf32, #tpu.memory_space<vmem>>, vector<1x8x256xf32>,
    %c0_7 = arith.constant 0 : index
    %c0_8 = arith.constant 0 : index
    %c0_9 = arith.constant 0 : index
    %7 = vector.load %arg3[%c0_7, %c0_8, %c0_9] : memref<1x16x16xf32, #tpu.memory_space<vmem>>, vector<1x16x16xf32>
    %8 = vector.shape_cast %7 : vector<1x16x16xf32> to vector<16x16xf32>
    %c0_10 = arith.constant 0 : index
    %c0_11 = arith.constant 0 : index
    %9 = vector.load %arg4[%c0_10, %c0_11] : memref<16x256xf32, #tpu.memory_space<vmem>>, vector<16x256xf32>
    %cst_12 = arith.constant dense<0.000000e+00> : vector<16x256xf32>
    %10 = tpu.matmul %8, %9, %cst_12 {dimension_numbers = #tpu.dot_dimension_numbers<[1], [0], [0], [1], [0, 0, 1, 1], [], []>} : vector<16x16xf32>, vector<16x256xf32>, vector<16x256xf32> -> vector<16x256xf32>
    %c0_13 = arith.constant 0 : index
    %c8 = arith.constant 8 : index
    %c0_14 = arith.constant 0 : index
    %11 = vector.load %arg5[%c0_13, %c8, %c0_14] : memref<1x24x256xf32, #tpu.memory_space<vmem>>, vector<1x16x256xf32>
    %12 = vector.shape_cast %11 : vector<1x16x256xf32> to vector<16x256xf32>
    %13 = vector.shape_cast %10 : vector<16x256xf32> to vector<1x16x256xf32>
    tpu.vector_store %arg5[%c0_13, %c8, %c0_14], %13 {strides = array<i32>} : memref<1x24x256xf32, #tpu.memory_space<vmem>>, vector<1x16x256xf32>,
    return
  }
  func.func @transform_0(%arg0: i32) -> (i32, i32, i32) {
    %c0_i32 = arith.constant 0 : i32
    %c0_i32_0 = arith.constant 0 : i32
    %c0_i32_1 = arith.constant 0 : i32
    return %arg0, %c0_i32, %c0_i32_0 : i32, i32, i32
  }
  func.func @transform_1(%arg0: i32) -> (i32, i32) {
    %c0_i32 = arith.constant 0 : i32
    %c0_i32_0 = arith.constant 0 : i32
    %c0_i32_1 = arith.constant 0 : i32
    return %c0_i32, %c0_i32_0 : i32, i32
  }
  func.func @transform_2(%arg0: i32) -> (i32, i32, i32) {
    %c0_i32 = arith.constant 0 : i32
    %c0_i32_0 = arith.constant 0 : i32
    %c0_i32_1 = arith.constant 0 : i32
    return %arg0, %c0_i32, %c0_i32_0 : i32, i32, i32
  }
  func.func @transform_3(%arg0: i32) -> (i32, i32) {
    %c0_i32 = arith.constant 0 : i32
    %c0_i32_0 = arith.constant 0 : i32
    %c0_i32_1 = arith.constant 0 : i32
    return %c0_i32, %c0_i32_0 : i32, i32
  }
  func.func @transform_4(%arg0: i32) -> (i32, i32, i32) {
    %c0_i32 = arith.constant 0 : i32
    %c0_i32_0 = arith.constant 0 : i32
    %c0_i32_1 = arith.constant 0 : i32
    return %arg0, %c0_i32, %c0_i32_0 : i32, i32, i32
  }
}

</mosaic_0001>

<bundles_post_ra>
// kernel: backbone_wrapper_forward.4
= control target key start
LH: loop header
LB: loop body
LE: loop exit
PB: predicated region body
PF: predicated region fallthrough
CT: control target
= control target key end

     0   :  { %s494_s12 = smov 0   ;;  %s496_s13 = smov 0   ;;  %s541_s0 = inlined_call_operand.vmem [shape: f32[2,4,8,16], index: 0, kind: input, shape index: {}]   ;;  %s542_s1 = inlined_call_operand.vmem [shape: f32[16,8], index: 1, kind: input, shape index: {}]   ;;  %s543_s2 = inlined_call_operand.vmem [shape: f32[16,1], index: 2, kind: input, shape index: {}]   ;;  %s544_s3 = inlined_call_operand.vmem [shape: f32[2,16,16], index: 3, kind: output, shape index: {}]  }
   0x1   :  { %s498_s14 = smov 0  }
   0x2 LB: > { %s25_s15 = sadd.s32 1, %s467_s13  ;;  %p401_p0 = scmp.ge.s32.totalorder %s471_s14, 1  ;;  %s471_s14 = sphi %s498_s14, %s13_s14   ;;  %s467_s13 = sphi %s496_s13, %s546_s13   ;;  %s463_s12 = sphi %s494_s12, %s545_s12  }
   0x3   : > { %p27_p1 = scmp.ge.s32.totalorder %s25_s15, 2  ;;  %p156_p2 = scmp.lt.s32.totalorder %s471_s14, 3 }
   0x5   : > { %s548_s15 = smov (%p27_p1, %s25_s15), 0  ;;  %p157_p3 = pnand %p401_p0, %p156_p2 }
   0x6   : > { %p186_p4 = scmp.lt.s32.totalorder (!%p157_p3), %s463_s12, 1  ;;  %v213_v0 = vld [vmem:[%s542_s1] sm:$0xff] (!%p157_p3)  ;;  %vm227_vm0 = vcmask (!%p157_p3), 64512   ;;  %v473_v2 = vmov (!%p157_p3), 0   ;;  %v216_v3 = vld [vmem:[%s543_s2 + $0x8] sm:$0xff] (!%p157_p3)  ;;  %vm311_vm1 = vcmask (!%p157_p3), 130048  }
   0x7   : > { %160 = sbr.rel (%p157_p3) target bundleno = 246 (0xf6), region = 32  ;;  %v215_v1 = vld [vmem:[%s543_s2] sm:$0xff] (!%p157_p3)  ;;  %420 = vmatprep.mubr.msk.f32.mxu0 (!%p157_p3), %vm227_vm0, %v213_v0  ;;  %448 = vset.pattern.permute.xlu0 (!%p157_p3), %v473_v2  ;;  %v214_v12 = vld [vmem:[%s542_s1 + $0x8] sm:$0xff] (!%p157_p3) }
   0x8   : > { %219 = vperm.xlu0 (!%p157_p3), %448, %v215_v1  }
   0xc   : > { %224 = vperm.xlu0 (!%p157_p3), %448, %v216_v3  }
   0xe   : > { %s550_s12 = smov (!%p186_p4, %s463_s12), 1 }
   0xf   : > { %s413_s22 = sshll.u32 %s550_s12, 5  ;;  %s414_s28 = sshll.u32 %s550_s12, 4 }
  0x10   : > { %s193_s25 = scalar_lea.vmem %s541_s0, %s413_s22  ;;  %s201_s4 = scalar_lea.vmem %s544_s3, %s414_s28 }
  0x11   : > { %v202_v4 = vld [vmem:[%s193_s25] sm:$0xff]  ;;  %v406_v5 = vld [vmem:[%s193_s25 + $0x8] sm:$0xff]  ;;  %v407_v6 = vld [vmem:[%s193_s25 + $0x10] sm:$0xff] }
  0x12   : > { %v205_v7 = vadd.f32 %v406_v5, %v202_v4  ;;  %v408_v8 = vld [vmem:[%s193_s25 + $0x18] sm:$0xff] }
  0x14   : > { %v208_v9 = vadd.f32 %v407_v6, %v205_v7 }
  0x16   : > { %v211_v10 = vadd.f32 %v408_v8, %v208_v9 }
  0x18   : > { %v212_v11 = vmul.f32 0.25, %v211_v10 }
  0x1a   : > { %418 = vmatprep.subr.mxu0 %v212_v11 }
  0x1b   : > { %419 = vmatpush3.msra.mxu0 %v212_v11 }
  0x1c   : > { %421 = vmatmul.mubr.msk.f32.vlgmr.msra.gmra.mrb[0].mxu0 %vm227_vm0, %v214_v12 }
  0x87   : > { %v220_v13 = vpop.permute.xlu0 %219 }
  0x8b   : > { %v225_v14 = vpop.permute.xlu0 %224 }
  0xef   : > { %v422_v15 = vpop.f32.mrb[0].mxu0 }
  0xf0   : > { %v306_v16 = vadd.f32 %v422_v15, %v225_v14  ;;  %v300_v17 = vpop.f32.mrb[1].mxu0 }
  0xf1   : > { %v301_v18 = vadd.f32 %v300_v17, %v220_v13 }
  0xf2   : > { %v310_v19 = vmax.f32 %v306_v16, 0.0 }
  0xf3   : > { %v309_v20 = vmax.f32 %v301_v18, 0.0 }
  0xf4   : > { %313 = vst.msk [vmem:[%s201_s4 + $0x8] sm:$0xff] %vm311_vm1, %v310_v19 }
  0xf5   : > { %312 = vst.msk [vmem:[%s201_s4] sm:$0xff] %vm311_vm1, %v309_v20 }
  0xf6 PF: > { %s13_s14 = sadd.s32 1, %s471_s14   ;;  %s545_s12 = smov %s467_s13 }
  0xf7   : > { %p10_p5 = scmp.ge.s32.totalorder %s13_s14, 4   ;;  %s546_s13 = smov %s548_s15 }
  0xf9   :  { %12 = sbr.rel (!%p10_p5) target bundleno = 2 (0x2), region = 65 }

// kernel: backbone_wrapper_forward.5
= control target key start
LH: loop header
LB: loop body
LE: loop exit
PB: predicated region body
PF: predicated region fallthrough
CT: control target
= control target key end

     0   :  { %s549_s15 = smov 0   ;;  %s634_s0 = inlined_call_operand.vmem [shape: f32[2,8,64], index: 0, kind: input, shape index: {}]   ;;  %s635_s1 = inlined_call_operand.vmem [shape: f32[64,256], index: 1, kind: input, shape index: {}]   ;;  %s636_s2 = inlined_call_operand.vmem [shape: f32[2,16,16], index: 2, kind: input, shape index: {}]   ;;  %s637_s3 = inlined_call_operand.vmem [shape: f32[16,256], index: 3, kind: input, shape index: {}]   ;;  %s638_s4 = inlined_call_operand.vmem [shape: f32[2,24,256], index: 4, kind: output, shape index: {}]  }
   0x1 LB: > { %s470_s16 = sadd.s32 4294967295, %s521_s15   ;;  %p474_p0 = scmp.ge.s32.totalorder %s521_s15, 1  ;;  %s521_s15 = sphi %s549_s15, %s14_s15  }
   0x2   : > { %p171_p1 = scmp.lt.s32.totalorder %s521_s15, 3 }
   0x4   : > { %p172_p2 = pnand %p474_p0, %p171_p1 }
   0x5   : > { %v217_v0 = vld [vmem:[%s635_s1 + $0x8] sm:$0xff] (!%p172_p2)  ;;  %v219_v1 = vld [vmem:[%s635_s1 + $0x18] sm:$0xff] (!%p172_p2)  ;;  %v216_v2 = vld [vmem:[%s635_s1] sm:$0xff] (!%p172_p2)  ;;  %p201_p3 = scmp.lt.s32.totalorder (!%p172_p2), %s470_s16, 1  ;;  %v523_v7 = vmov (!%p172_p2), 0.0   ;;  %vm315_vm0 = vcmask (!%p172_p2), 130048  }
   0x6   : > { %175 = sbr.rel (%p172_p2) target bundleno = 238 (0xee), region = 36  ;;  %v485_v3 = vpack.c.bf16 (!%p172_p2), %v219_v1, %v217_v0  ;;  %v218_v4 = vld [vmem:[%s635_s1 + $0x10] sm:$0xff] (!%p172_p2)  ;;  %v221_v5 = vld [vmem:[%s635_s1 + $0x28] sm:$0xff] (!%p172_p2)  ;;  %v223_v6 = vld [vmem:[%s635_s1 + $0x38] sm:$0xff] (!%p172_p2)  ;;  %386 = vmatprep.mubr.f32.mxu1 (!%p172_p2), %v523_v7  ;;  %300 = vmatprep.mubr.f32.mxu0 (!%p172_p2), %v523_v7  ;;  %vm232_vm1 = vcmask (!%p172_p2), 523264  }
   0x7   : > { %v487_v8 = vpack.c.bf16 (!%p172_p2), %v218_v4, %v216_v2  ;;  %v489_v9 = vpack.c.bf16 (!%p172_p2), %v223_v6, %v221_v5  ;;  %v220_v10 = vld [vmem:[%s635_s1 + $0x20] sm:$0xff] (!%p172_p2)  ;;  %v222_v11 = vld [vmem:[%s635_s1 + $0x30] sm:$0xff] (!%p172_p2)  ;;  %v312_v12 = vld [vmem:[%s637_s3 + $0x8] sm:$0xff] (!%p172_p2) }
   0x8   : > { %486 = vmatprep.subr.bf16.mxu0 (!%p172_p2), %v485_v3  ;;  %v314_v13 = vld [vmem:[%s637_s3 + $0x18] sm:$0xff] (!%p172_p2)  ;;  %v225_v14 = vld [vmem:[%s635_s1 + $0x48] sm:$0xff] (!%p172_p2)  ;;  %v491_v16 = vpack.c.bf16 (!%p172_p2), %v222_v11, %v220_v10  ;;  %v311_v18 = vld [vmem:[%s637_s3] sm:$0xff] (!%p172_p2) }
   0x9   : > { %v227_v15 = vld [vmem:[%s635_s1 + $0x58] sm:$0xff] (!%p172_p2)  ;;  %488 = vmatpush1.bf16.msra.mxu0 (!%p172_p2), %v487_v8  ;;  %v501_v17 = vpack.c.bf16 (!%p172_p2), %v314_v13, %v312_v12  ;;  %v313_v19 = vld [vmem:[%s637_s3 + $0x10] sm:$0xff] (!%p172_p2)  ;;  %v224_v22 = vld [vmem:[%s635_s1 + $0x40] sm:$0xff] (!%p172_p2) }
   0xa   : > { %490 = vmatprep.subr.bf16.mxu0 (!%p172_p2), %v489_v9  ;;  %v493_v20 = vpack.c.bf16 (!%p172_p2), %v227_v15, %v225_v14  ;;  %v503_v21 = vpack.c.bf16 (!%p172_p2), %v313_v19, %v311_v18  ;;  %v226_v23 = vld [vmem:[%s635_s1 + $0x50] sm:$0xff] (!%p172_p2)  ;;  %v229_v24 = vld [vmem:[%s635_s1 + $0x68] sm:$0xff] (!%p172_p2)  ;;  %v231_v25 = vld [vmem:[%s635_s1 + $0x78] sm:$0xff] (!%p172_p2) }
   0xb   : > { %502 = vmatprep.subr.bf16.mxu1 (!%p172_p2), %v501_v17  ;;  %v495_v27 = vpack.c.bf16 (!%p172_p2), %v226_v23, %v224_v22  ;;  %v497_v28 = vpack.c.bf16 (!%p172_p2), %v231_v25, %v229_v24  ;;  %v228_v29 = vld [vmem:[%s635_s1 + $0x60] sm:$0xff] (!%p172_p2)  ;;  %v230_v30 = vld [vmem:[%s635_s1 + $0x70] sm:$0xff] (!%p172_p2) }
   0xc   : > { %504 = vmatpush1.bf16.msra.mxu1 (!%p172_p2), %v503_v21  ;;  %v499_v32 = vpack.c.bf16 (!%p172_p2), %v230_v30, %v228_v29 }
   0xd   : > { %s640_s16 = smov (!%p201_p3, %s470_s16), 1  ;;  %492 = vmatpush1.bf16.msra.mxu0 %v491_v16 }
   0xe   : > { %s484_s21 = sshll.u32 %s640_s16, 4  ;;  %494 = vmatprep.subr.bf16.mxu0 %v493_v20  ;;  %s475_s11 = sshll.u32 %s640_s16, 3 }
   0xf   : > { %s209_s28 = scalar_lea.vmem %s636_s2, %s484_s21  ;;  %s204_s14 = scalar_lea.vmem %s634_s0, %s475_s11 }
  0x10   : > { %v309_v26 = vld [vmem:[%s209_s28] sm:$0xff]  ;;  %v310_v31 = vld [vmem:[%s209_s28 + $0x8] sm:$0xff]  ;;  %s505_s17 = smul.u32 48, %s640_s16 }
  0x11   : > { %480 = vmatmul.mubr.msk.f32.vlgmr.msra.gmra.mrb[0].mxu1 %vm315_vm0, %v309_v26  ;;  %496 = vmatpush1.bf16.msra.mxu0 %v495_v27  ;;  %v215_v33 = vld [vmem:[%s204_s14] sm:$0xff] }
  0x12   : > { %392 = vmatprep.mubr.f32.mxu1 %v523_v7  ;;  %498 = vmatprep.subr.bf16.mxu0 %v497_v28  ;;  %s214_s20 = scalar_lea.vmem %s638_s4, %s505_s17 }
  0x15   : > { %481 = vmatmul.mubr.msk.f32.gmra.mrb[2].mxu1 %vm315_vm0, %v310_v31  ;;  %500 = vmatpush1.bf16.msra.mxu0 %v499_v32 }
  0x18   : > { %479 = vmatmul.mubr.msk.f32.vlgmr.msra.gmra.mrb[0].mxu0 %vm232_vm1, %v215_v33 }
  0xe4   : > { %v388_v34 = vpop.f32.mrb[0].mxu1 }
  0xe5   : > { %399 = vst [vmem:[%s214_s20 + $0x10] sm:$0xff] %v388_v34  ;;  %v390_v35 = vpop.f32.mrb[1].mxu1 }
  0xe6   : > { %400 = vst [vmem:[%s214_s20 + $0x18] sm:$0xff] %v390_v35 }
  0xe8   : > { %v394_v36 = vpop.f32.mrb[2].mxu1 }
  0xe9   : > { %401 = vst [vmem:[%s214_s20 + $0x20] sm:$0xff] %v394_v36  ;;  %v396_v37 = vpop.f32.mrb[3].mxu1 }
  0xea   : > { %402 = vst [vmem:[%s214_s20 + $0x28] sm:$0xff] %v396_v37 }
  0xeb   : > { %v302_v38 = vpop.f32.mrb[0].mxu0 }
  0xec   : > { %307 = vst [vmem:[%s214_s20] sm:$0xff] %v302_v38  ;;  %v304_v39 = vpop.f32.mrb[1].mxu0 }
  0xed   : > { %308 = vst [vmem:[%s214_s20 + $0x8] sm:$0xff] %v304_v39 }
  0xee PF: > { %s14_s15 = sadd.s32 1, %s521_s15  }
  0xef   : > { %p11_p4 = scmp.ge.s32.totalorder %s14_s15, 4  }
  0xf1   :  { %13 = sbr.rel (!%p11_p4) target bundleno = 1 (0x1), region = 69 }

// kernel: backbone_wrapper_forward.3
= control target key start
LH: loop header
LB: loop body
LE: loop exit
PB: predicated region body
PF: predicated region fallthrough
CT: control target
= control target key end

     0   :  { %s474_s12 = smov 0   ;;  %s476_s13 = smov 0   ;;  %s513_s0 = inlined_call_operand.vmem [shape: f32[2,4,4,64], index: 0, kind: input, shape index: {}]   ;;  %s514_s1 = inlined_call_operand.vmem [shape: f32[8,4], index: 1, kind: input, shape index: {}]   ;;  %s515_s2 = inlined_call_operand.vmem [shape: f32[8,1], index: 2, kind: input, shape index: {}]   ;;  %s516_s3 = inlined_call_operand.vmem [shape: f32[2,8,64], index: 3, kind: output, shape index: {}]  }
   0x1   :  { %s478_s14 = smov 0  }
   0x2 LB: > { %s25_s15 = sadd.s32 1, %s445_s13  ;;  %p380_p0 = scmp.ge.s32.totalorder %s449_s14, 1  ;;  %s449_s14 = sphi %s478_s14, %s13_s14   ;;  %s445_s13 = sphi %s476_s13, %s518_s13   ;;  %s441_s12 = sphi %s474_s12, %s517_s12  }
   0x3   : > { %p27_p1 = scmp.ge.s32.totalorder %s25_s15, 2  ;;  %p156_p2 = scmp.lt.s32.totalorder %s449_s14, 3 }
   0x5   : > { %s520_s15 = smov (%p27_p1, %s25_s15), 0  ;;  %p157_p3 = pnand %p380_p0, %p156_p2 }
   0x6   : > { %p185_p4 = scmp.lt.s32.totalorder (!%p157_p3), %s441_s12, 1  ;;  %v451_v0 = vmov (!%p157_p3), 0.0   ;;  %vm452_vm0 = vmmov (!%p157_p3), 0   ;;  %v212_v1 = vld [vmem:[%s515_s2] sm:$0xff] (!%p157_p3)  ;;  %v453_v2 = vmov (!%p157_p3), 0   ;;  %vm222_vm1 = vcmask (!%p157_p3), 1043456  }
   0x7   : > { %160 = sbr.rel (%p157_p3) target bundleno = 244 (0xf4), region = 32  ;;  %394 = vmatprep.subr.mxu0 (!%p157_p3), %v451_v0  ;;  %396 = vmatprep.mubr.msk.f32.mxu0 (!%p157_p3), %vm452_vm0, %v451_v0  ;;  %v211_v11 = vld [vmem:[%s514_s1] sm:$0xff] (!%p157_p3)  ;;  %vm218_vm2 = vcmask (!%p157_p3), 31744   ;;  %vm297_vm3 = vcmask (!%p157_p3), 523264  }
   0x8   : > { %426 = vset.pattern.permute.xlu0 (!%p157_p3), %v453_v2 }
   0x9   : > { %215 = vperm.xlu0 (!%p157_p3), %426, %v212_v1  }
   0xe   : > { %s522_s12 = smov (!%p185_p4, %s441_s12), 1 }
   0xf   : > { %s391_s18 = sshll.u32 %s522_s12, 4  ;;  %s383_s24 = sshll.u32 %s522_s12, 3 }
  0x10   : > { %s192_s21 = scalar_lea.vmem %s513_s0, %s391_s18  ;;  %s199_s27 = scalar_lea.vmem %s516_s3, %s383_s24 }
  0x11   : > { %v200_v3 = vld [vmem:[%s192_s21] sm:$0xf]  ;;  %v384_v4 = vld [vmem:[%s192_s21 + $0x4] sm:$0xf]  ;;  %v385_v5 = vld [vmem:[%s192_s21 + $0x8] sm:$0xf] }
  0x12   : > { %v203_v6 = vadd.f32 %v384_v4, %v200_v3  ;;  %v386_v7 = vld [vmem:[%s192_s21 + $0xc] sm:$0xf] }
  0x14   : > { %v206_v8 = vadd.f32 %v385_v5, %v203_v6 }
  0x16   : > { %v209_v9 = vadd.f32 %v386_v7, %v206_v8 }
  0x18   : > { %v210_v10 = vmul.f32 0.25, %v209_v9 }
  0x1a   : > { %395 = vmatpush3.msk.msra.mxu0 %vm222_vm1, %v210_v10 }
  0x1b   : > { %397 = vmatmul.mubr.msk.f32.vlgmr.msra.gmra.mrb[0].mxu0 %vm218_vm2, %v211_v11 }
  0x88   : > { %v216_v12 = vpop.permute.xlu0 %215 }
  0xee   : > { %v292_v13 = vpop.f32.mrb[0].mxu0 }
  0xef   : > { %v293_v14 = vadd.f32 %v292_v13, %v216_v12  ;;  %v398_v15 = vpop.f32.mrb[1].mxu0 }
  0xf1   : > { %v296_v16 = vmax.f32 %v293_v14, 0.0 }
  0xf3   : > { %298 = vst.msk [vmem:[%s199_s27] sm:$0xff] %vm297_vm3, %v296_v16 }
  0xf4 PF: > { %s13_s14 = sadd.s32 1, %s449_s14   ;;  %s517_s12 = smov %s445_s13 }
  0xf5   : > { %p10_p5 = scmp.ge.s32.totalorder %s13_s14, 4   ;;  %s518_s13 = smov %s520_s15 }
  0xf7   :  { %12 = sbr.rel (!%p10_p5) target bundleno = 2 (0x2), region = 65 }

</bundles_post_ra>
